<compile_context>
chip_gen: v7x
topology: tpu7x:2x2x1
jax: 0.10.0
libtpu: 0.0.40
codegen_flags: <defaults>
</compile_context>

<pallas_src>
import functools
import math

import jax
import jax.numpy as jnp
from jax import lax
from jax.experimental import pallas as pl
from jax.experimental.pallas import tpu as pltpu

_MIB = 1024 * 1024


# ---------------------------------------------------------------------------
# Generation-aware VMEM budgets.
# ---------------------------------------------------------------------------
def _vmem_capacity_bytes():
    try:
        info = pltpu.get_tpu_info()
        cap = getattr(info, "vmem_capacity_bytes", None)
        if cap:
            return int(cap)
    except Exception:
        pass
    return 64 * _MIB  # conservative fallback (v7x per-TC VMEM)


def _budgets():
    cap = _vmem_capacity_bytes()
    # Input and output blocks are each double-buffered => ~4 blocks resident.
    # Target ~8 MiB blocks (<= cap/8), which fits v7x's 64 MiB and saturates
    # HBM on v5e/v6e while leaving pipelining depth.
    block_budget = max(_MIB, min(cap // 8, 8 * _MIB))
    vmem_limit = int(min(cap * 3 // 4, 64 * _MIB))
    return block_budget, vmem_limit


def _round_up(v, m):
    return -(-v // m) * m


def _round_down(v, m):
    return (v // m) * m


def _choose_pack(c):
    """Rows-per-lane-row packing factor for small channel counts."""
    if c >= 128:
        return 1
    g = math.gcd(c, 128)
    pack_lane = 128 // g          # smallest pack making pack*c a multiple of 128
    if c * pack_lane <= 384:      # keep the (L, L) averaging matmul cheap
        return pack_lane
    if 128 // c >= 2:
        return 128 // c           # L <= 128: not lane-full, but wider stores
    return 1


# ---------------------------------------------------------------------------
# channels_last kernels: rows on sublanes, (packed) channels on lanes.
# ---------------------------------------------------------------------------
def _ln_rows_kernel(x_ref, w_ref, b_ref, o_ref, *, eps, c):
    x = x_ref[...].astype(jnp.float32)                   # (TM, C)
    inv_c = 1.0 / c
    mean = jnp.sum(x, axis=-1, keepdims=True) * inv_c
    ex2 = jnp.sum(x * x, axis=-1, keepdims=True) * inv_c
    var = jnp.maximum(ex2 - mean * mean, 0.0)
    inv = lax.rsqrt(var + eps)
    w = w_ref[...].astype(jnp.float32)
    b = b_ref[...].astype(jnp.float32)
    o_ref[...] = ((x - mean) * (inv * w) + b).astype(o_ref.dtype)


def _ln_rows_packed_kernel(x_ref, w_ref, b_ref, a_ref, o_ref, *, eps, c):
    # x: (TM, L), L = pack*C.  a: (L, L) block-diagonal averaging matrix with
    # 1/C on each CxC diagonal block -> per-sub-row mean / E[x^2] in one MXU
    # matmul each, already broadcast back to all lanes of the group.
    x = x_ref[...].astype(jnp.float32)
    a = a_ref[...]
    mean_b = jnp.dot(x, a, preferred_element_type=jnp.float32)
    ex2_b = jnp.dot(x * x, a, preferred_element_type=jnp.float32)
    var = jnp.maximum(ex2_b - mean_b * mean_b, 0.0)
    inv = lax.rsqrt(var + eps)
    w = w_ref[...].astype(jnp.float32)
    b = b_ref[...].astype(jnp.float32)
    o_ref[...] = ((x - mean_b) * (inv * w) + b).astype(o_ref.dtype)


def _layer_norm_last(x, weight, bias, eps, max_rows_per_tile=None):
    """LayerNorm over the last dim of x (any leading dims)."""
    orig_shape = x.shape
    C = int(orig_shape[-1])
    x2 = x.reshape(-1, C)
    R = x2.shape[0]
    itemsize = jnp.dtype(x.dtype).itemsize
    block_budget, vmem_limit = _budgets()

    pack = _choose_pack(C)
    pad_rows = 0
    if pack > 1:
        pad_rows = (-R) % pack
        if pad_rows:
            # Pad with zeros; padded rows produce finite (discarded) outputs.
            x2 = jnp.pad(x2, ((0, pad_rows), (0, 0)))
    L = pack * C
    Rp = (R + pad_rows) // pack
    x2 = x2.reshape(Rp, L)

    # Lane l uses weight/bias of channel l % C.
    w2 = jnp.tile(weight.reshape(1, C), (1, pack))
    b2 = jnp.tile(bias.reshape(1, C), (1, pack))

    # Row tile: dtype-native sublane multiple, sized from the VMEM block
    # budget, clamped so the grid keeps >= ~4 steps when there is enough work.
    sub = max(8, 32 // itemsize)
    tm_cap = block_budget // max(1, L * itemsize)
    tm_cap = max(sub, _round_down(tm_cap, sub))
    if max_rows_per_tile is not None:
        tm_cap = max(sub, min(tm_cap, _round_down(int(max_rows_per_tile), sub)))
    if Rp >= 4 * sub:
        tm_cap = min(tm_cap, max(sub, _round_up((Rp + 3) // 4, sub)))
    TM = Rp if Rp <= tm_cap else tm_cap

    in_specs = [
        pl.BlockSpec((TM, L), lambda i: (i, 0)),
        pl.BlockSpec((1, L), lambda i: (0, 0)),
        pl.BlockSpec((1, L), lambda i: (0, 0)),
    ]
    args = [x2, w2, b2]
    if pack > 1:
        lane = jnp.arange(L, dtype=jnp.int32)
        amat = (lane[:, None] // C == lane[None, :] // C).astype(jnp.float32)
        amat = amat / float(C)
        in_specs.append(pl.BlockSpec((L, L), lambda i: (0, 0)))
        args.append(amat)
        kernel = functools.partial(_ln_rows_packed_kernel, eps=float(eps), c=C)
        mm_flops = 4 * Rp * L * L
    else:
        kernel = functools.partial(_ln_rows_kernel, eps=float(eps), c=C)
        mm_flops = 0

    out = pl.pallas_call(
        kernel,
        out_shape=jax.ShapeDtypeStruct((Rp, L), x.dtype),
        grid_spec=pltpu.PrefetchScalarGridSpec(
            num_scalar_prefetch=0,
            grid=(pl.cdiv(Rp, TM),),
            in_specs=in_specs,
            out_specs=pl.BlockSpec((TM, L), lambda i: (i, 0)),
        ),
        compiler_params=pltpu.CompilerParams(
            dimension_semantics=("parallel",),
            vmem_limit_bytes=vmem_limit),
        cost_estimate=pl.CostEstimate(
            flops=8 * R * C + mm_flops,
            transcendentals=R,
            bytes_accessed=2 * R * C * itemsize),
    )(*args)

    out = out.reshape(R + pad_rows, C)
    if pad_rows:
        out = out[:R]
    return out.reshape(orig_shape)


# ---------------------------------------------------------------------------
# channels_first kernel: channels on sublanes, spatial on lanes, batch tiled.
# ---------------------------------------------------------------------------
def _ln_cf_kernel(x_ref, w_ref, b_ref, o_ref, *, eps, c):
    x = x_ref[...].astype(jnp.float32)                    # (TB, C, TN)
    inv_c = 1.0 / c
    mean = jnp.sum(x, axis=1, keepdims=True) * inv_c      # (TB, 1, TN)
    ex2 = jnp.sum(x * x, axis=1, keepdims=True) * inv_c
    var = jnp.maximum(ex2 - mean * mean, 0.0)
    inv = lax.rsqrt(var + eps)
    w = w_ref[...].astype(jnp.float32)                    # (1, C, 1)
    b = b_ref[...].astype(jnp.float32)
    o_ref[...] = ((x - mean) * (inv * w) + b).astype(o_ref.dtype)


def _layer_norm_channels_first(x, weight, bias, eps):
    B, C = int(x.shape[0]), int(x.shape[1])
    HW = 1
    for d in x.shape[2:]:
        HW *= int(d)
    x3 = x.reshape(B, C, HW)
    itemsize = jnp.dtype(x.dtype).itemsize
    block_budget, vmem_limit = _budgets()

    per_b_bytes = C * HW * itemsize
    if per_b_bytes <= block_budget:
        # Small spatial: take the full (C, HW) slab and tile the batch axis.
        TN = HW
        TB = max(1, block_budget // per_b_bytes)
        if B >= 4:
            TB = min(TB, max(1, (B + 3) // 4))  # keep >= 4 grid steps
        TB = min(TB, B)
    else:
        TB = 1
        if HW <= 128:
            TN = HW
        else:
            tn_cap = block_budget // max(1, C * itemsize)
            TN = max(128, _round_down(tn_cap, 128))
            if HW >= 4 * 128:
                TN = min(TN, max(128, _round_up((HW + 3) // 4, 128)))
            TN = min(TN, _round_down(HW, 128))
    grid = (pl.cdiv(B, TB), pl.cdiv(HW, TN))

    w2 = weight.reshape(1, C, 1)
    b2 = bias.reshape(1, C, 1)

    kernel = functools.partial(_ln_cf_kernel, eps=float(eps), c=C)
    out = pl.pallas_call(
        kernel,
        out_shape=jax.ShapeDtypeStruct((B, C, HW), x.dtype),
        grid_spec=pltpu.PrefetchScalarGridSpec(
            num_scalar_prefetch=0,
            grid=grid,
            in_specs=[
                pl.BlockSpec((TB, C, TN), lambda bi, j: (bi, 0, j)),
                pl.BlockSpec((1, C, 1), lambda bi, j: (0, 0, 0)),
                pl.BlockSpec((1, C, 1), lambda bi, j: (0, 0, 0)),
            ],
            out_specs=pl.BlockSpec((TB, C, TN), lambda bi, j: (bi, 0, j)),
        ),
        compiler_params=pltpu.CompilerParams(
            dimension_semantics=("parallel", "parallel"),
            vmem_limit_bytes=vmem_limit),
        cost_estimate=pl.CostEstimate(
            flops=8 * B * C * HW,
            transcendentals=B * HW,
            bytes_accessed=2 * B * C * HW * itemsize),
    )(x3, w2, b2)

    return out.reshape(x.shape)


@functools.partial(jax.jit, static_argnames=("eps", "data_format"))
def layer_norm(x, weight, bias, eps=1e-6, data_format="channels_last"):
    if data_format == "channels_last":
        return _layer_norm_last(x, weight, bias, eps)
    elif data_format == "channels_first":
        return _layer_norm_channels_first(x, weight, bias, eps)
    else:
        raise NotImplementedError(data_format)


# ---------------------------------------------------------------------------
# References (pure JAX, match the PyTorch module).
# ---------------------------------------------------------------------------
def _reference_channels_last(x, w, b, eps):
    mean = jnp.mean(x, axis=-1, keepdims=True)
    var = jnp.mean((x - mean) ** 2, axis=-1, keepdims=True)
    return (x - mean) / jnp.sqrt(var + eps) * w + b


def _reference_channels_first(x, w, b, eps):
    u = jnp.mean(x, axis=1, keepdims=True)
    s = jnp.mean((x - u) ** 2, axis=1, keepdims=True)
    xn = (x - u) / jnp.sqrt(s + eps)
    return w[None, :, None, None] * xn + b[None, :, None, None]


if __name__ == "__main__":
    key = jax.random.PRNGKey(0)
    eps = 1e-6

    # --- test 1: channels_last, C=32 (lane-packed pack=4, L=128) ---
    C = 32
    weight = jnp.ones((C,), jnp.float32) + 0.01 * jnp.arange(C, dtype=jnp.float32)
    bias = jnp.zeros((C,), jnp.float32) + 0.001 * jnp.arange(C, dtype=jnp.float32)
    k1, k2, k3, k4, k5 = jax.random.split(key, 5)

    x_cl = jax.random.normal(k1, (2, 8, 8, C), jnp.float32)
    y_cl = jax.block_until_ready(
        layer_norm(x_cl, weight, bias, eps=eps, data_format="channels_last"))
    ref_cl = _reference_channels_last(x_cl, weight, bias, eps)
    assert jnp.allclose(y_cl, ref_cl, atol=1e-4, rtol=1e-4), "channels_last mismatch"

    # --- test 2: channels_first, C=32 (transpose-free NCHW kernel, batch-tiled) ---
    x_cf = jax.random.normal(k2, (2, C, 8, 8), jnp.float32)
    y_cf = jax.block_until_ready(
        layer_norm(x_cf, weight, bias, eps=eps, data_format="channels_first"))
    ref_cf = _reference_channels_first(x_cf, weight, bias, eps)
    assert jnp.allclose(y_cf, ref_cf, atol=1e-4, rtol=1e-4), "channels_first mismatch"

    # --- test 3: channels_last, C=64 (pack=2) with a small forced tile so the
    #     multi-step grid + ragged last tile path is exercised ---
    C2 = 64
    w2 = jnp.ones((C2,), jnp.float32) + 0.01 * jnp.arange(C2, dtype=jnp.float32)
    b2 = jnp.zeros((C2,), jnp.float32) + 0.001 * jnp.arange(C2, dtype=jnp.float32)
    x_cl2 = jax.random.normal(k3, (2, 10, 10, C2), jnp.float32)
    y_cl2 = jax.block_until_ready(
        _layer_norm_last(x_cl2, w2, b2, eps, max_rows_per_tile=32))
    ref_cl2 = _reference_channels_last(x_cl2, w2, b2, eps)
    assert jnp.allclose(y_cl2, ref_cl2, atol=1e-4, rtol=1e-4), "ragged/packed mismatch"

    # --- test 4: channels_last, C=96 (pack=4, L=384, row remainder padded) ---
    C3 = 96
    w3 = jnp.ones((C3,), jnp.float32) + 0.01 * jnp.arange(C3, dtype=jnp.float32)
    b3 = jnp.zeros((C3,), jnp.float32) + 0.001 * jnp.arange(C3, dtype=jnp.float32)
    x_cl3 = jax.random.normal(k4, (2, 5, 5, C3), jnp.float32)
    y_cl3 = jax.block_until_ready(
        layer_norm(x_cl3, w3, b3, eps=eps, data_format="channels_last"))
    ref_cl3 = _reference_channels_last(x_cl3, w3, b3, eps)
    assert jnp.allclose(y_cl3, ref_cl3, atol=1e-4, rtol=1e-4), "C=96 packed mismatch"

    # --- test 5: channels_last bf16 (sublane multiple 16, multi-step grid) ---
    x_bf = jax.random.normal(k5, (4, 8, 8, C), jnp.float32).astype(jnp.bfloat16)
    y_bf = jax.block_until_ready(
        _layer_norm_last(x_bf, weight, bias, eps, max_rows_per_tile=32))
    ref_bf = _reference_channels_last(x_bf.astype(jnp.float32), weight, bias, eps)
    assert jnp.allclose(y_bf.astype(jnp.float32), ref_bf, atol=5e-2, rtol=5e-2), \
        "bf16 mismatch"

    print("KERNEL_OK")
</pallas_src>

<mosaic_0001>
module attributes {stable_mosaic.version = 11 : i64} {
  func.func @_ln_rows_packed_kernel(%arg0: i32, %arg1: memref<8x128xf32, #tpu.memory_space<vmem>>, %arg2: memref<1x128xf32, #tpu.memory_space<vmem>>, %arg3: memref<1x128xf32, #tpu.memory_space<vmem>>, %arg4: memref<128x128xf32, #tpu.memory_space<vmem>>, %arg5: memref<8x128xf32, #tpu.memory_space<vmem>>) attributes {dimension_semantics = [#tpu.dimension_semantics<parallel>], iteration_bounds = array<i64: 4>, scalar_prefetch = 0 : i64, scratch_operands = 0 : i64, tpu.core_type = #tpu.core_type<tc>, window_params = [{transform_indices = @transform_0, window_bounds = array<i64: 8, 128>}, {pipeline_mode = #tpu.pipeline_mode<synchronous>, transform_indices = @transform_1, window_bounds = array<i64: 1, 128>}, {pipeline_mode = #tpu.pipeline_mode<synchronous>, transform_indices = @transform_2, window_bounds = array<i64: 1, 128>}, {pipeline_mode = #tpu.pipeline_mode<synchronous>, transform_indices = @transform_3, window_bounds = array<i64: 128, 128>}, {transform_indices = @transform_4, window_bounds = array<i64: 8, 128>}]} {
    %c0 = arith.constant 0 : index
    %c0_0 = arith.constant 0 : index
    %0 = vector.load %arg1[%c0, %c0_0] : memref<8x128xf32, #tpu.memory_space<vmem>>, vector<8x128xf32>
    %c0_1 = arith.constant 0 : index
    %c0_2 = arith.constant 0 : index
    %1 = vector.load %arg4[%c0_1, %c0_2] : memref<128x128xf32, #tpu.memory_space<vmem>>, vector<128x128xf32>
    %cst = arith.constant dense<0.000000e+00> : vector<8x128xf32>
    %2 = tpu.matmul %0, %1, %cst {dimension_numbers = #tpu.dot_dimension_numbers<[1], [0], [0], [1], [0, 0, 1, 1], [], []>} : vector<8x128xf32>, vector<128x128xf32>, vector<8x128xf32> -> vector<8x128xf32>
    %3 = arith.mulf %0, %0 : vector<8x128xf32>
    %cst_3 = arith.constant dense<0.000000e+00> : vector<8x128xf32>
    %4 = tpu.matmul %3, %1, %cst_3 {dimension_numbers = #tpu.dot_dimension_numbers<[1], [0], [0], [1], [0, 0, 1, 1], [], []>} : vector<8x128xf32>, vector<128x128xf32>, vector<8x128xf32> -> vector<8x128xf32>
    %5 = arith.mulf %2, %2 : vector<8x128xf32>
    %6 = arith.subf %4, %5 : vector<8x128xf32>
    %cst_4 = arith.constant 0.000000e+00 : f32
    %7 = vector.broadcast %cst_4 : f32 to vector<8x128xf32>
    %8 = arith.maximumf %6, %7 : vector<8x128xf32>
    %cst_5 = arith.constant 9.99999997E-7 : f32
    %9 = vector.broadcast %cst_5 : f32 to vector<8x128xf32>
    %10 = arith.addf %8, %9 : vector<8x128xf32>
    %11 = math.rsqrt %10 : vector<8x128xf32>
    %c0_6 = arith.constant 0 : index
    %c0_7 = arith.constant 0 : index
    %12 = vector.load %arg2[%c0_6, %c0_7] : memref<1x128xf32, #tpu.memory_space<vmem>>, vector<1x128xf32>
    %c0_8 = arith.constant 0 : index
    %c0_9 = arith.constant 0 : index
    %13 = vector.load %arg3[%c0_8, %c0_9] : memref<1x128xf32, #tpu.memory_space<vmem>>, vector<1x128xf32>
    %14 = arith.subf %0, %2 : vector<8x128xf32>
    %15 = vector.broadcast %12 : vector<1x128xf32> to vector<8x128xf32>
    %16 = arith.mulf %11, %15 : vector<8x128xf32>
    %17 = arith.mulf %14, %16 : vector<8x128xf32>
    %18 = vector.broadcast %13 : vector<1x128xf32> to vector<8x128xf32>
    %19 = arith.addf %17, %18 : vector<8x128xf32>
    %c0_10 = arith.constant 0 : index
    %c0_11 = arith.constant 0 : index
    %20 = vector.load %arg5[%c0_10, %c0_11] : memref<8x128xf32, #tpu.memory_space<vmem>>, vector<8x128xf32>
    tpu.vector_store %arg5[%c0_10, %c0_11], %19 {strides = array<i32>} : memref<8x128xf32, #tpu.memory_space<vmem>>, vector<8x128xf32>,
    return
  }
  func.func @transform_0(%arg0: i32) -> (i32, i32) {
    %c0_i32 = arith.constant 0 : i32
    %c0_i32_0 = arith.constant 0 : i32
    return %arg0, %c0_i32 : i32, i32
  }
  func.func @transform_1(%arg0: i32) -> (i32, i32) {
    %c0_i32 = arith.constant 0 : i32
    %c0_i32_0 = arith.constant 0 : i32
    %c0_i32_1 = arith.constant 0 : i32
    return %c0_i32, %c0_i32_0 : i32, i32
  }
  func.func @transform_2(%arg0: i32) -> (i32, i32) {
    %c0_i32 = arith.constant 0 : i32
    %c0_i32_0 = arith.constant 0 : i32
    %c0_i32_1 = arith.constant 0 : i32
    return %c0_i32, %c0_i32_0 : i32, i32
  }
  func.func @transform_3(%arg0: i32) -> (i32, i32) {
    %c0_i32 = arith.constant 0 : i32
    %c0_i32_0 = arith.constant 0 : i32
    %c0_i32_1 = arith.constant 0 : i32
    return %c0_i32, %c0_i32_0 : i32, i32
  }
  func.func @transform_4(%arg0: i32) -> (i32, i32) {
    %c0_i32 = arith.constant 0 : i32
    %c0_i32_0 = arith.constant 0 : i32
    return %arg0, %c0_i32 : i32, i32
  }
}

</mosaic_0001>

<bundles_post_ra>
// kernel: layer_norm.1
= control target key start
LH: loop header
LB: loop body
LE: loop exit
PB: predicated region body
PF: predicated region fallthrough
CT: control target
= control target key end

     0   :  { %s640_s15 = smov 0   ;;  %s722_s0 = inlined_call_operand.vmem [shape: f32[32,128], index: 0, kind: input, shape index: {}]   ;;  %s723_s1 = inlined_call_operand.vmem [shape: f32[1,128], index: 1, kind: input, shape index: {}]   ;;  %s724_s2 = inlined_call_operand.vmem [shape: f32[1,128], index: 2, kind: input, shape index: {}]   ;;  %s725_s3 = inlined_call_operand.vmem [shape: f32[128,128], index: 3, kind: input, shape index: {}]   ;;  %s726_s4 = inlined_call_operand.vmem [shape: f32[32,128], index: 4, kind: output, shape index: {}]  }
   0x1 LB: > { %s428_s16 = sadd.s32 4294967295, %s610_s15   ;;  %p432_p0 = scmp.ge.s32.totalorder %s610_s15, 1  ;;  %s610_s15 = sphi %s640_s15, %s14_s15  }
   0x2   : > { %p161_p1 = scmp.lt.s32.totalorder %s610_s15, 5 }
   0x4   : > { %p162_p2 = pnand %p432_p0, %p161_p1 }
   0x5   : > { %v194_v0 = vld [vmem:[%s725_s3] sm:$0xff] (!%p162_p2)  ;;  %v195_v1 = vld [vmem:[%s725_s3 + $0x8] sm:$0xff] (!%p162_p2)  ;;  %v196_v2 = vld [vmem:[%s725_s3 + $0x10] sm:$0xff] (!%p162_p2)  ;;  %v612_v3 = vmov (!%p162_p2), 0.0|0.0   ;;  %vm613_vm0 = vmmov (!%p162_p2), 0   ;;  %v614_v6 = vmov (!%p162_p2), 0.0  }
   0x6   : > { %165 = sbr.rel (%p162_p2) target bundleno = 277 (0x115), region = 36  ;;  %543 = vmatprep.subr.bf16.mxu0 (!%p162_p2), %v612_v3  ;;  %v544_v4 = vpack.c.bf16 (!%p162_p2), %v195_v1, %v194_v0  ;;  %567 = vmatprep.subr.bf16.mxu1 (!%p162_p2), %v612_v3  ;;  %v197_v5 = vld [vmem:[%s725_s3 + $0x18] sm:$0xff] (!%p162_p2)  ;;  %v198_v8 = vld [vmem:[%s725_s3 + $0x20] sm:$0xff] (!%p162_p2)  ;;  %v199_v9 = vld [vmem:[%s725_s3 + $0x28] sm:$0xff] (!%p162_p2)  ;;  %p185_p3 = scmp.lt.s32.totalorder (!%p162_p2), %s428_s16, 3 }
   0x7   : > { %505 = vmatprep.mubr.msk.f32.mxu0 (!%p162_p2), %vm613_vm0, %v614_v6  ;;  %540 = vmatprep.mubr.msk.f32.mxu1 (!%p162_p2), %vm613_vm0, %v614_v6  ;;  %v547_v7 = vpack.c.bf16 (!%p162_p2), %v197_v5, %v196_v2  ;;  %v550_v10 = vpack.c.bf16 (!%p162_p2), %v199_v9, %v198_v8  ;;  %v200_v11 = vld [vmem:[%s725_s3 + $0x30] sm:$0xff] (!%p162_p2)  ;;  %v201_v12 = vld [vmem:[%s725_s3 + $0x38] sm:$0xff] (!%p162_p2)  ;;  %v202_v14 = vld [vmem:[%s725_s3 + $0x40] sm:$0xff] (!%p162_p2) }
   0x8   : > { %545 = vmatpush3.bf16.msra.mxu0 (!%p162_p2), %v544_v4  ;;  %569 = vmatpush3.bf16.msra.mxu1 (!%p162_p2), %v544_v4  ;;  %v553_v13 = vpack.c.bf16 (!%p162_p2), %v201_v12, %v200_v11  ;;  %v203_v15 = vld [vmem:[%s725_s3 + $0x48] sm:$0xff] (!%p162_p2)  ;;  %v204_v17 = vld [vmem:[%s725_s3 + $0x50] sm:$0xff] (!%p162_p2)  ;;  %v205_v18 = vld [vmem:[%s725_s3 + $0x58] sm:$0xff] (!%p162_p2) }
   0x9   : > { %546 = vmatprep.subr.bf16.mxu0 (!%p162_p2), %v612_v3  ;;  %570 = vmatprep.subr.bf16.mxu1 (!%p162_p2), %v612_v3  ;;  %v556_v16 = vpack.c.bf16 (!%p162_p2), %v203_v15, %v202_v14  ;;  %v559_v19 = vpack.c.bf16 (!%p162_p2), %v205_v18, %v204_v17  ;;  %v206_v20 = vld [vmem:[%s725_s3 + $0x60] sm:$0xff] (!%p162_p2)  ;;  %v207_v21 = vld [vmem:[%s725_s3 + $0x68] sm:$0xff] (!%p162_p2)  ;;  %v208_v23 = vld [vmem:[%s725_s3 + $0x70] sm:$0xff] (!%p162_p2) }
   0xa   : > { %v562_v22 = vpack.c.bf16 (!%p162_p2), %v207_v21, %v206_v20  ;;  %v209_v24 = vld [vmem:[%s725_s3 + $0x78] sm:$0xff] (!%p162_p2)  ;;  %v435_v36 = vld [vmem:[%s723_s1] ss:$0 sm:$0xff] (!%p162_p2) }
   0xb   : > { %v565_v25 = vpack.c.bf16 (!%p162_p2), %v209_v24, %v208_v23  ;;  %v436_v40 = vld [vmem:[%s724_s2] ss:$0 sm:$0xff] (!%p162_p2) }
   0xc   : > { %548 = vmatpush3.bf16.msra.mxu0 (!%p162_p2), %v547_v7  ;;  %572 = vmatpush3.bf16.msra.mxu1 (!%p162_p2), %v547_v7 }
   0xd   : > { %549 = vmatprep.subr.bf16.mxu0 %v612_v3  ;;  %573 = vmatprep.subr.bf16.mxu1 %v612_v3  ;;  %s728_s16 = smov (!%p185_p3, %s428_s16), 3 }
   0xe   : > { %s433_s21 = sshll.u32 %s728_s16, 3 }
   0xf   : > { %s188_s28 = scalar_lea.vmem %s722_s0, %s433_s21  ;;  %s192_s9 = scalar_lea.vmem %s726_s4, %s433_s21 }
  0x10   : > { %551 = vmatpush3.bf16.msra.mxu0 %v550_v10  ;;  %575 = vmatpush3.bf16.msra.mxu1 %v550_v10  ;;  %v193_v26 = vld [vmem:[%s188_s28] sm:$0xff] }
  0x11   : > { %552 = vmatprep.subr.bf16.mxu0 %v612_v3  ;;  %576 = vmatprep.subr.bf16.mxu1 %v612_v3  ;;  %v280_v27 = vmul.f32 %v193_v26, %v193_v26 }
  0x14   : > { %554 = vmatpush3.bf16.msra.mxu0 %v553_v13  ;;  %578 = vmatpush3.bf16.msra.mxu1 %v553_v13 }
  0x15   : > { %555 = vmatprep.subr.bf16.mxu0 %v612_v3  ;;  %579 = vmatprep.subr.bf16.mxu1 %v612_v3 }
  0x18   : > { %557 = vmatpush3.bf16.msra.mxu0 %v556_v16  ;;  %581 = vmatpush3.bf16.msra.mxu1 %v556_v16 }
  0x19   : > { %558 = vmatprep.subr.bf16.mxu0 %v612_v3  ;;  %582 = vmatprep.subr.bf16.mxu1 %v612_v3 }
  0x1c   : > { %560 = vmatpush3.bf16.msra.mxu0 %v559_v19  ;;  %584 = vmatpush3.bf16.msra.mxu1 %v559_v19 }
  0x1d   : > { %561 = vmatprep.subr.bf16.mxu0 %v612_v3  ;;  %585 = vmatprep.subr.bf16.mxu1 %v612_v3 }
  0x20   : > { %563 = vmatpush3.bf16.msra.mxu0 %v562_v22  ;;  %587 = vmatpush3.bf16.msra.mxu1 %v562_v22 }
  0x21   : > { %564 = vmatprep.subr.bf16.mxu0 %v612_v3  ;;  %588 = vmatprep.subr.bf16.mxu1 %v612_v3 }
  0x24   : > { %566 = vmatpush3.bf16.msra.mxu0 %v565_v25  ;;  %590 = vmatpush3.bf16.msra.mxu1 %v565_v25 }
  0x27   : > { %506 = vmatmul.mubr.f32.vlgmr.msra.gmra.mrb[0].mxu0 %v193_v26  ;;  %541 = vmatmul.mubr.f32.vlgmr.msra.gmra.mrb[0].mxu1 %v280_v27 }
  0xfa   : > { %v276_v28 = vpop.f32.mrb[0].mxu0  ;;  %v347_v29 = vpop.f32.mrb[0].mxu1 }
  0xfb   : > { %v351_v30 = vmul.f32 %v276_v28, %v276_v28  ;;  %v507_v31 = vpop.f32.mrb[1].mxu0  ;;  %v542_v32 = vpop.f32.mrb[1].mxu1  ;;  %v358_v38 = vsub.f32 %v193_v26, %v276_v28 }
  0xfd   : > { %v352_v33 = vsub.f32 %v347_v29, %v351_v30 }
  0xff   : > { %v353_v34 = vmax.f32 %v352_v33, 0.0 }
 0x101   : > { %v354_v35 = vadd.f32 1e-06, %v353_v34 }
 0x103   : > { %602 = vrsqrt.f32 %v354_v35 }
 0x10d   : > { %v603_v37 = vpop.eup %602 }
 0x10e   : > { %v365_v39 = vmul.f32 %v603_v37, %v435_v36 }
 0x110   : > { %v366_v41 = vmul.f32 %v365_v39, %v358_v38 }
 0x112   : > { %v373_v42 = vadd.f32 %v436_v40, %v366_v41 }
 0x114   : > { %374 = vst [vmem:[%s192_s9] sm:$0xff] %v373_v42 }
 0x115 PF: > { %s14_s15 = sadd.s32 1, %s610_s15  }
 0x116   : > { %p11_p4 = scmp.ge.s32.totalorder %s14_s15, 6  }
 0x118   :  { %13 = sbr.rel (!%p11_p4) target bundleno = 1 (0x1), region = 66 }

</bundles_post_ra>
